<compile_context>
chip_gen: v7x
topology: tpu7x:2x2x1
jax: 0.10.0
libtpu: 0.0.40
codegen_flags: <defaults>
</compile_context>

<pallas_src>
import jax
import jax.numpy as jnp
from jax import lax
from jax.experimental import pallas as pl
from jax.experimental.pallas import tpu as pltpu


def _round_up(x: int, m: int) -> int:
    return (x + m - 1) // m * m


def _make_row_sum_kernel(nspb: int, tl: int, hw: int, needs_mask: bool):
    """Kernel accumulating per-row f32 sums of (TR, TL) tiles.

    nspb: spatial blocks per parallel split; tl: lane tile; hw: true H*W.
    needs_mask: whether the logical spatial extent (P*nspb*TL) exceeds hw.
    """

    def kernel(x_ref, out_ref):
        j = pl.program_id(2)  # spatial (reduction) axis

        @pl.when(j == 0)
        def _():
            out_ref[...] = jnp.zeros_like(out_ref)

        x = x_ref[...]
        if needs_mask:
            p = pl.program_id(0)
            g = p * nspb + j  # nominal global spatial-block id
            lane = lax.broadcasted_iota(jnp.int32, x.shape, 1)
            # Lanes past H*W (ragged tail, or a fully duplicated clamped block
            # when the spatial split is uneven) contribute exactly 0.
            x = jnp.where(g * tl + lane < hw, x, 0)

        # Partial per-row sum of this tile; accumulate in f32 regardless of
        # the input dtype.
        s = jnp.sum(x, axis=-1, keepdims=True, dtype=jnp.float32)  # (TR, 1)
        out_ref[...] += s  # lane-broadcast into the dense (1, TR, 128) block

    return kernel


def color_constancy_loss(enhances: jax.Array, *, max_block_bytes: int = 8 << 20) -> jax.Array:
    """enhances: (B, 3, H, W) float array (NCHW). Returns scalar float32 loss."""
    B, C, H, W = enhances.shape
    assert C == 3, "color constancy loss expects 3 channels (R, G, B)"
    HW = H * W
    R = B * C

    x = enhances.reshape(R, HW)  # contiguous reshape: no data movement
    itemsize = jnp.dtype(x.dtype).itemsize
    # Sublane packing for the dtype: f32 -> 8, bf16 -> 16, int8/fp8 -> 32.
    pack = max(8, 32 // itemsize)

    # ---- tile selection --------------------------------------------------
    # Lane tile: multiple of 128, capped so `pack` rows x TL ~<= max_block_bytes.
    max_tl = max(128, (max_block_bytes // (pack * itemsize)) // 128 * 128)
    TL = min(_round_up(HW, 128), max_tl)
    # Row tile: multiple of the sublane packing; pack more rows per block for
    # small images so each grid step moves enough bytes.
    max_tr = max(pack, (max_block_bytes // (TL * itemsize)) // pack * pack)
    R_pad = _round_up(R, pack)
    TR = min(R_pad, max_tr)

    row_blocks = pl.cdiv(R, TR)
    spatial_total = pl.cdiv(HW, TL)
    # Guarantee >= 2 blocks on a "parallel" axis for v7x's two TensorCores:
    # if there is only one row block, split the spatial range in two.
    P = 2 if (row_blocks == 1 and spatial_total >= 2) else 1
    nspb = pl.cdiv(spatial_total, P)
    needs_mask = (P * nspb * TL) != HW

    kernel = _make_row_sum_kernel(nspb, TL, HW, needs_mask)

    def in_map(p, i, j):
        # Clamp so an uneven spatial split never requests an out-of-range
        # block (the duplicate block is fully masked to 0 in the kernel).
        return (i, jnp.minimum(p * nspb + j, spatial_total - 1))

    sums = pl.pallas_call(
        kernel,
        out_shape=jax.ShapeDtypeStruct((P, row_blocks * TR, 128), jnp.float32),
        grid_spec=pltpu.PrefetchScalarGridSpec(
            num_scalar_prefetch=0,
            grid=(P, row_blocks, nspb),
            in_specs=[pl.BlockSpec((TR, TL), in_map)],
            # Lane-dense f32 accumulator slab, resident across the spatial axis.
            out_specs=pl.BlockSpec((1, TR, 128), lambda p, i, j: (p, i, 0)),
        ),
        compiler_params=pltpu.CompilerParams(
            # Split axis + row-block axis are independent (shard across v7x
            # TensorCores); the spatial axis carries the accumulator.
            dimension_semantics=("parallel", "parallel", "arbitrary"),
            vmem_limit_bytes=32 * 1024 * 1024,
        ),
    )(x)

    # ---- finalize in plain JAX (O(B), negligible) ------------------------
    row_sums = jnp.sum(sums[:, :R, 0], axis=0)  # (R,) ; drops padded garbage rows
    chan_means = row_sums.reshape(B, C) * (1.0 / HW)
    r, g, b = chan_means[:, 0], chan_means[:, 1], chan_means[:, 2]
    return jnp.mean((r - g) ** 2 + (g - b) ** 2 + (b - r) ** 2)


def _reference_loss(enhances: jax.Array) -> jax.Array:
    plane_avg = enhances.astype(jnp.float32).mean(axis=(2, 3))  # (B, 3)
    r, g, b = plane_avg[:, 0], plane_avg[:, 1], plane_avg[:, 2]
    return jnp.mean((r - g) ** 2 + (g - b) ** 2 + (b - r) ** 2)


if __name__ == "__main__":
    # Small, forward-consistent shape: batch=2, channels=3 (RGB), spatial=16x16.
    x = jax.random.uniform(jax.random.PRNGKey(0), (2, 3, 16, 16), dtype=jnp.float32)
    loss = jax.block_until_ready(color_constancy_loss(x))
    ref = jax.block_until_ready(_reference_loss(x))
    assert jnp.allclose(loss, ref, rtol=1e-5, atol=1e-6), (loss, ref)

    # Ragged shape exercising the logical row-tail + in-kernel lane mask.
    y = jax.random.uniform(jax.random.PRNGKey(1), (5, 3, 17, 19), dtype=jnp.float32)
    loss2 = jax.block_until_ready(color_constancy_loss(y))
    ref2 = jax.block_until_ready(_reference_loss(y))
    assert jnp.allclose(loss2, ref2, rtol=1e-5, atol=1e-6), (loss2, ref2)

    # Tiny block cap to exercise the multi-step reduction, the 2-way spatial
    # split (v7x parallel path) and the clamped/duplicated-block mask.
    z = jax.random.uniform(jax.random.PRNGKey(2), (2, 3, 50, 60), dtype=jnp.float32)
    loss3 = jax.block_until_ready(color_constancy_loss(z, max_block_bytes=32 * 1024))
    ref3 = jax.block_until_ready(_reference_loss(z))
    assert jnp.allclose(loss3, ref3, rtol=1e-5, atol=1e-6), (loss3, ref3)

    print("KERNEL_OK")
</pallas_src>

<mosaic_0001>
module attributes {stable_mosaic.version = 11 : i64} {
  func.func @kernel(%arg0: i32, %arg1: i32, %arg2: i32, %arg3: memref<8x256xf32, #tpu.memory_space<vmem>>, %arg4: memref<1x8x128xf32, #tpu.memory_space<vmem>>) attributes {dimension_semantics = [#tpu.dimension_semantics<parallel>, #tpu.dimension_semantics<parallel>, #tpu.dimension_semantics<arbitrary>], iteration_bounds = array<i64: 1, 1, 1>, scalar_prefetch = 0 : i64, scratch_operands = 0 : i64, tpu.core_type = #tpu.core_type<tc>, window_params = [{transform_indices = @transform_0, window_bounds = array<i64: 8, 256>}, {transform_indices = @transform_1, window_bounds = array<i64: 1, 8, 128>}]} {
    %c0_i32 = arith.constant 0 : i32
    %0 = arith.cmpi eq, %arg2, %c0_i32 : i32
    %1 = arith.extui %0 : i1 to i32
    %c0_i32_0 = arith.constant 0 : i32
    %2 = arith.cmpi ne, %1, %c0_i32_0 : i32
    scf.if %2 {
      %cst_8 = arith.constant 0.000000e+00 : f32
      %11 = vector.broadcast %cst_8 : f32 to vector<1x8x128xf32>
      %c0_9 = arith.constant 0 : index
      %c0_10 = arith.constant 0 : index
      %c0_11 = arith.constant 0 : index
      %12 = vector.load %arg4[%c0_9, %c0_10, %c0_11] : memref<1x8x128xf32, #tpu.memory_space<vmem>>, vector<1x8x128xf32>
      tpu.vector_store %arg4[%c0_9, %c0_10, %c0_11], %11 {strides = array<i32>} : memref<1x8x128xf32, #tpu.memory_space<vmem>>, vector<1x8x128xf32>,
    } else {
    }
    %c0 = arith.constant 0 : index
    %c0_1 = arith.constant 0 : index
    %3 = vector.load %arg3[%c0, %c0_1] : memref<8x256xf32, #tpu.memory_space<vmem>>, vector<8x256xf32>
    %cst = arith.constant dense<0.000000e+00> : vector<8xf32>
    %4 = vector.multi_reduction <add>, %3, %cst [1] : vector<8x256xf32> to vector<8xf32>
    %5 = vector.shape_cast %4 : vector<8xf32> to vector<8x1xf32>
    %c0_2 = arith.constant 0 : index
    %c0_3 = arith.constant 0 : index
    %c0_4 = arith.constant 0 : index
    %6 = vector.load %arg4[%c0_2, %c0_3, %c0_4] : memref<1x8x128xf32, #tpu.memory_space<vmem>>, vector<1x8x128xf32>
    %7 = vector.shape_cast %5 : vector<8x1xf32> to vector<1x8x1xf32>
    %8 = vector.broadcast %7 : vector<1x8x1xf32> to vector<1x8x128xf32>
    %9 = arith.addf %6, %8 : vector<1x8x128xf32>
    %c0_5 = arith.constant 0 : index
    %c0_6 = arith.constant 0 : index
    %c0_7 = arith.constant 0 : index
    %10 = vector.load %arg4[%c0_5, %c0_6, %c0_7] : memref<1x8x128xf32, #tpu.memory_space<vmem>>, vector<1x8x128xf32>
    tpu.vector_store %arg4[%c0_5, %c0_6, %c0_7], %9 {strides = array<i32>} : memref<1x8x128xf32, #tpu.memory_space<vmem>>, vector<1x8x128xf32>,
    return
  }
  func.func @transform_0(%arg0: i32, %arg1: i32, %arg2: i32) -> (i32, i32) {
    %c1_i32 = arith.constant 1 : i32
    %0 = arith.muli %arg0, %c1_i32 : i32
    %1 = arith.addi %0, %arg2 : i32
    %c0_i32 = arith.constant 0 : i32
    %2 = arith.minsi %1, %c0_i32 : i32
    %c0_i32_0 = arith.constant 0 : i32
    return %arg1, %2 : i32, i32
  }
  func.func @transform_1(%arg0: i32, %arg1: i32, %arg2: i32) -> (i32, i32, i32) {
    %c0_i32 = arith.constant 0 : i32
    %c0_i32_0 = arith.constant 0 : i32
    return %arg0, %arg1, %c0_i32 : i32, i32, i32
  }
}

</mosaic_0001>

<bundles_post_ra>
// kernel: tpu_custom_call.1
= control target key start
LH: loop header
LB: loop body
LE: loop exit
PB: predicated region body
PF: predicated region fallthrough
CT: control target
= control target key end

     0   :  { %6 = vsyncpa [#allocation3], 0  ;;  %s148_s0 = inlined_call_operand.hbm [shape: f32[6,256], index: 0, kind: input, shape index: {}]   ;;  %s149_s1 = inlined_call_operand.hbm [shape: f32[1,8,128], index: 1, kind: output, shape index: {}]  }
   0x1   :  { %7 = vsyncpa [#allocation4], 0  ;;  %s112_s6 = smov [#allocation2]   ;;  %s64_s10 = scalar_lea.hbm %s148_s0, 256 }
   0x2   :  { %s20_s7 = sshll.u32 %s112_s6, 4  ;;  %p65_p0 = scmp.ne.s32.totalorder %s148_s0, %s64_s10  ;;  %s21_s7 = int_to_ptr.vmem [resolvable:$true] %s20_s7 }
   0x3   :  { %p68_p1 = scmp.lt.u32.totalorder %s64_s10, %s148_s0 }
   0x5   :  { %p70_p2 = pnand %p68_p1, %p65_p0 }
   0x7   :  { %73 = shalt.err (!%p70_p2)
}
   0x8   :  { %s74_s15 = scalar_lea.vmem %s21_s7, 256  ;;  %p79_p4 = scmp.lt.s32.totalorder %s21_s7, %s21_s7 }
   0x9   :  { %p75_p3 = scmp.ne.s32.totalorder %s21_s7, %s74_s15  ;;  %p80_p5 = scmp.lt.s32.totalorder %s74_s15, %s74_s15 }
   0xb   :  { %p81_p6 = por %p80_p5, %p79_p4 }
   0xd   :  { %p82_p7 = pnand %p81_p6, %p75_p3 }
   0xf   :  { %85 = shalt.err (!%p82_p7)
}
  0x10   :  { %23 = dma.hbm_to_vmem [thread:$0]  %s148_s0, 256, %s21_s7, [#allocation3]  }
  0x11   :  { %108 = dma.done.wait [#allocation3], 256  }
  0x12   :  { %109 = vsyncadd [#allocation3], 4294967040  ;;  %v36_v0 = vld [vmem:[#allocation2] sm:$0xff]  ;;  %v37_v1 = vld [vmem:[#allocation2 + $0x8] sm:$0xff]  ;;  %s113_s18 = smov [#allocation5]  }
  0x13   :  { %v38_v2 = vadd.f32 %v37_v1, %v36_v0  ;;  %s50_s19 = sshll.u32 %s113_s18, 4  ;;  %s51_s19 = int_to_ptr.vmem [resolvable:$true] %s50_s19 }
  0x14   :  { %s86_s20 = scalar_lea.vmem %s51_s19, 128  ;;  %p91_p9 = scmp.lt.s32.totalorder %s51_s19, %s51_s19 }
  0x15   :  { %39 = vadd.xlane.f32.xlu0 %v38_v2  ;;  %p87_p8 = scmp.ne.s32.totalorder %s51_s19, %s86_s20  ;;  %p92_p10 = scmp.lt.s32.totalorder %s86_s20, %s86_s20 }
  0x17   :  { %p93_p11 = por %p92_p10, %p91_p9 }
  0x19   :  { %p94_p12 = pnand %p93_p11, %p87_p8 }
  0xa2   :  { %v40_v3 = vpop.xlane.xlu0 %39 }
  0xa3   :  { %43 = vst [vmem:[#allocation5] sm:$0xff] %v40_v3 }
  0xa4   :  { %97 = shalt.err (!%p94_p12)
}
  0xa5   :  { %s98_s22 = scalar_lea.hbm %s149_s1, 128 }
  0xa6   :  { %p99_p13 = scmp.ne.s32.totalorder %s149_s1, %s98_s22  ;;  %p102_p0 = scmp.lt.u32.totalorder %s98_s22, %s149_s1 }
  0xa8   :  { %p104_p1 = pnand %p102_p0, %p99_p13 }
  0xaa   :  { %107 = shalt.err (!%p104_p1)
}
  0xab   :  { %53 = dma.vmem_to_hbm [thread:$0]  %s51_s19, 128, %s149_s1, [#allocation4]  }
  0xac   :  { %110 = dma.done.wait [#allocation4], 128  }
  0xad   :  { %111 = vsyncadd [#allocation4], 4294967168 }
  0xae   :  { %57 = vsyncpa [#allocation3], 1 }
  0xaf   :  { %58 = vsyncpa [#allocation4], 1 }

</bundles_post_ra>
